<compile_context>
chip_gen: v7x
topology: tpu7x:2x2x1
jax: 0.10.0
libtpu: 0.0.40
codegen_flags: <defaults>
</compile_context>

<pallas_src>
from functools import partial

import jax
import jax.numpy as jnp
from jax.experimental import pallas as pl
from jax.experimental.pallas import tpu as pltpu

H1 = 256   # fc1 width (fixed by the PyTorch module)
H2 = 128   # fc2 width (fixed by the PyTorch module)

# packed-bias lane slices below rely on these being 128-lane aligned
assert H1 % 128 == 0 and (H1 + H2) % 128 == 0


def _round_up(n, m):
    return ((n + m - 1) // m) * m


def _cdiv(a, b):
    return -(-a // b)


def _policy_kernel(x_ref, w1_ref, w2_ref, wh_ref, b_ref, out_ref):
    """One batch tile: fc1 -> relu -> fc2 -> relu -> fused(actor|critic) head.

    b_ref packs [b1 | b2 | b_head_padded] along lanes at 128-aligned offsets.
    Weights may be bf16 (activations cast at the dot inputs); accumulation and all
    elementwise math are f32.  Final store casts to out_ref.dtype (f32 or bf16).
    """
    wdt = w1_ref.dtype
    x = x_ref[...]

    b1 = b_ref[:, 0:H1]                 # (1, 256)
    b2 = b_ref[:, H1:H1 + H2]           # (1, 128)
    bh = b_ref[:, H1 + H2:]             # (1, HPAD)

    h1 = jnp.dot(x.astype(wdt), w1_ref[...],
                 preferred_element_type=jnp.float32) + b1
    h1 = jnp.maximum(h1, 0.0)           # F.relu(fc1(x)), f32 on the VPU

    h2 = jnp.dot(h1.astype(wdt), w2_ref[...],
                 preferred_element_type=jnp.float32) + b2
    h2 = jnp.maximum(h2, 0.0)           # F.relu(fc2(x))

    # Fused actor|critic head: one MXU op, one lane-dense (unmasked) store.
    out_ref[...] = (jnp.dot(h2.astype(wdt), wh_ref[...],
                            preferred_element_type=jnp.float32)
                    + bh).astype(out_ref.dtype)


def prepare_params(params, param_dtype=jnp.bfloat16):
    """One-time parameter packing — call OUTSIDE the hot path.

    * actor/critic heads fused into one (H2, hpad) weight, hpad = round_up(A+1, 128)
      so the fused output is lane-dense.
    * all four biases packed into a single (1, 384 + hpad) row (one DMA, not four).
    * weights cast once to param_dtype (bf16 default: native MXU path on v6e/v7x and
      half the resident VMEM; accumulation stays f32 in the kernel).

    Returns (packed_params, action_space).
    """
    w1, b1, w2, b2, wa, ba, wc, bc = params
    A = wa.shape[1]
    hpad = _round_up(A + 1, 128)

    wh = jnp.zeros((H2, hpad), jnp.float32).at[:, :A].set(wa).at[:, A:A + 1].set(wc)
    bh = jnp.zeros((1, hpad), jnp.float32).at[:, :A].set(ba).at[:, A:A + 1].set(bc)
    b_all = jnp.concatenate([b1, b2, bh], axis=1)          # (1, 384 + hpad), f32

    w1c = w1.astype(param_dtype)
    w2c = w2.astype(param_dtype)
    whc = wh.astype(param_dtype)
    return (w1c, w2c, whc, b_all), A


@partial(jax.jit, static_argnames=("action_space", "tb", "out_dtype"))
def policy_network_forward(x, w1c, w2c, whc, b_all, *, action_space,
                           tb=1024, out_dtype=jnp.float32):
    """x: (B, input_size) float32.  Params come from prepare_params().

    Returns (logits (B, action_space), value (B, 1)) in out_dtype.

    tb: max rows per grid step.  Large tiles (1024-2048) amortize the ~0.35 us
        per-grid-step overhead on every generation (v5e included — its MXU only
        needs multiples of 128, not small tiles).  Small batches collapse to one
        tile; for B >= 1024 the tile count is forced even so v7x's two
        TensorCores each get work via the "parallel" grid axis.
    out_dtype: jnp.bfloat16 halves the dominant HBM writeback stream; f32
        accumulation is preserved inside the kernel either way.
    """
    B, input_size = x.shape
    A = action_space
    hpad = whc.shape[1]

    # --- batch tiling: minimal padding, even tile count for v7x when B is large ---
    ntiles = max(1, _cdiv(B, tb))
    if B >= 1024:                       # big enough to be worth 2 TCs on v7x
        if ntiles == 1:
            ntiles = 2
        elif ntiles % 2:
            ntiles += 1
    TB = _round_up(_cdiv(B, ntiles), 8)
    Bp = TB * ntiles                    # pads by < 8*ntiles rows (no 2x blowup)
    xp = x if Bp == B else jnp.pad(x, ((0, Bp - B), (0, 0)))
    grid = (ntiles,)

    def resident(arr):
        # same block every step -> weights/biases DMA'd once, VMEM-resident
        return pl.BlockSpec(arr.shape, lambda i: (0,) * arr.ndim)

    in_specs = [
        pl.BlockSpec((TB, input_size), lambda i: (i, 0)),   # x: tiled over batch
        resident(w1c), resident(w2c), resident(whc),        # weights
        resident(b_all),                                    # packed biases
    ]
    out_specs = pl.BlockSpec((TB, hpad), lambda i: (i, 0))  # lane-dense fused head

    itemsize = lambda a: a.size * a.dtype.itemsize
    out_isz = jnp.dtype(out_dtype).itemsize
    flops = 2 * Bp * (input_size * H1 + H1 * H2 + H2 * hpad)
    bytes_accessed = (itemsize(xp) + itemsize(w1c) + itemsize(w2c)
                      + itemsize(whc) + itemsize(b_all) + Bp * hpad * out_isz)

    # real VMEM footprint: double-buffered x/out tiles + resident params + activations
    wbytes = itemsize(w1c) + itemsize(w2c) + itemsize(whc) + itemsize(b_all)
    footprint = (2 * TB * input_size * 4 + 2 * TB * hpad * out_isz
                 + 2 * wbytes + TB * (H1 + H2 + hpad) * 4)
    vmem_limit = int(min(max(2 * footprint, 4 * 1024 * 1024), 32 * 1024 * 1024))

    out = pl.pallas_call(
        _policy_kernel,
        out_shape=jax.ShapeDtypeStruct((Bp, hpad), out_dtype),
        grid=grid,
        in_specs=in_specs,
        out_specs=out_specs,
        compiler_params=pltpu.CompilerParams(
            dimension_semantics=("parallel",),              # megacore shards batch tiles
            vmem_limit_bytes=vmem_limit,
        ),
        cost_estimate=pl.CostEstimate(
            flops=flops, transcendentals=0, bytes_accessed=bytes_accessed),
    )(xp, w1c, w2c, whc, b_all)

    logits = out[:B, :A]
    value = out[:B, A:A + 1]
    return logits, value


def init_params(key, input_size, action_space):
    """Deterministic init mimicking nn.Linear's U(-1/sqrt(fan_in), 1/sqrt(fan_in)).
    Weights are stored as (in_features, out_features)."""
    def linear(k, fan_in, fan_out):
        kw, kb = jax.random.split(k)
        bound = 1.0 / jnp.sqrt(fan_in)
        w = jax.random.uniform(kw, (fan_in, fan_out), jnp.float32, -bound, bound)
        b = jax.random.uniform(kb, (1, fan_out), jnp.float32, -bound, bound)
        return w, b

    k1, k2, k3, k4 = jax.random.split(key, 4)
    w1, b1 = linear(k1, input_size, H1)            # fc1
    w2, b2 = linear(k2, H1, H2)                    # fc2
    wa, ba = linear(k3, H2, action_space)          # actor
    wc, bc = linear(k4, H2, 1)                     # critic
    return w1, b1, w2, b2, wa, ba, wc, bc


def reference_forward(x, params):
    w1, b1, w2, b2, wa, ba, wc, bc = params
    h1 = jnp.maximum(x @ w1 + b1, 0.0)
    h2 = jnp.maximum(h1 @ w2 + b2, 0.0)
    return h2 @ wa + ba, h2 @ wc + bc


if __name__ == "__main__":
    batch = 8
    input_size = 32
    action_space = 8

    key = jax.random.PRNGKey(0)
    kx, kp = jax.random.split(key)
    x = jax.random.normal(kx, (batch, input_size), dtype=jnp.float32)
    params = init_params(kp, input_size, action_space)
    ref_logits, ref_value = reference_forward(x, params)

    # --- strict f32 path (exact weights), small batch -> single tile ---
    p32, A = prepare_params(params, param_dtype=jnp.float32)
    logits, value = policy_network_forward(x, *p32, action_space=A)
    jax.block_until_ready((logits, value))
    assert logits.shape == (batch, action_space)
    assert value.shape == (batch, 1)
    assert jnp.allclose(logits, ref_logits, atol=1e-4, rtol=1e-4)
    assert jnp.allclose(value, ref_value, atol=1e-4, rtol=1e-4)

    # --- multi-tile path: grid > 1 with minimal batch padding, f32 ---
    x_big = jax.random.normal(jax.random.PRNGKey(1), (40, input_size), jnp.float32)
    lg, vl = policy_network_forward(x_big, *p32, action_space=A, tb=16)  # 3 tiles of 16
    jax.block_until_ready((lg, vl))
    rlg, rvl = reference_forward(x_big, params)
    assert jnp.allclose(lg, rlg, atol=1e-4, rtol=1e-4)
    assert jnp.allclose(vl, rvl, atol=1e-4, rtol=1e-4)

    # --- default bf16-weight path (f32 accumulation), loose tolerance vs f32 ref ---
    # NOTE: bf16 weights can shift softmax(logits) at the ~1e-2 relative level;
    # pass param_dtype=jnp.float32 to prepare_params for exact training-time eval.
    pbf, _ = prepare_params(params)                         # bf16 default
    lg16, vl16 = policy_network_forward(x, *pbf, action_space=A)
    jax.block_until_ready((lg16, vl16))
    assert jnp.allclose(lg16, ref_logits, atol=1e-1, rtol=1e-1)
    assert jnp.allclose(vl16, ref_value, atol=1e-1, rtol=1e-1)

    # --- bf16 output writeback (f32 weights + f32 accumulation, bf16 final store) ---
    lg_o16, vl_o16 = policy_network_forward(x, *p32, action_space=A,
                                            out_dtype=jnp.bfloat16)
    jax.block_until_ready((lg_o16, vl_o16))
    assert lg_o16.dtype == jnp.bfloat16 and vl_o16.dtype == jnp.bfloat16
    assert jnp.allclose(lg_o16.astype(jnp.float32), ref_logits, atol=5e-2, rtol=5e-2)
    assert jnp.allclose(vl_o16.astype(jnp.float32), ref_value, atol=5e-2, rtol=5e-2)

    print("KERNEL_OK")
</pallas_src>

<mosaic_0001>
module attributes {stable_mosaic.version = 11 : i64} {
  func.func @_policy_kernel(%arg0: i32, %arg1: memref<8x32xf32, #tpu.memory_space<vmem>>, %arg2: memref<32x256xf32, #tpu.memory_space<vmem>>, %arg3: memref<256x128xf32, #tpu.memory_space<vmem>>, %arg4: memref<128x128xf32, #tpu.memory_space<vmem>>, %arg5: memref<1x512xf32, #tpu.memory_space<vmem>>, %arg6: memref<8x128xf32, #tpu.memory_space<vmem>>) attributes {dimension_semantics = [#tpu.dimension_semantics<parallel>], iteration_bounds = array<i64: 1>, scalar_prefetch = 0 : i64, scratch_operands = 0 : i64, tpu.core_type = #tpu.core_type<tc>, window_params = [{transform_indices = @transform_0, window_bounds = array<i64: 8, 32>}, {pipeline_mode = #tpu.pipeline_mode<synchronous>, transform_indices = @transform_1, window_bounds = array<i64: 32, 256>}, {pipeline_mode = #tpu.pipeline_mode<synchronous>, transform_indices = @transform_2, window_bounds = array<i64: 256, 128>}, {pipeline_mode = #tpu.pipeline_mode<synchronous>, transform_indices = @transform_3, window_bounds = array<i64: 128, 128>}, {pipeline_mode = #tpu.pipeline_mode<synchronous>, transform_indices = @transform_4, window_bounds = array<i64: 1, 512>}, {transform_indices = @transform_5, window_bounds = array<i64: 8, 128>}]} {
    %c0 = arith.constant 0 : index
    %c0_0 = arith.constant 0 : index
    %0 = vector.load %arg1[%c0, %c0_0] : memref<8x32xf32, #tpu.memory_space<vmem>>, vector<8x32xf32>
    %c0_1 = arith.constant 0 : index
    %c0_2 = arith.constant 0 : index
    %1 = vector.load %arg5[%c0_1, %c0_2] : memref<1x512xf32, #tpu.memory_space<vmem>>, vector<1x256xf32>
    %c0_3 = arith.constant 0 : index
    %c256 = arith.constant 256 : index
    %2 = vector.load %arg5[%c0_3, %c256] : memref<1x512xf32, #tpu.memory_space<vmem>>, vector<1x128xf32>
    %c0_4 = arith.constant 0 : index
    %c384 = arith.constant 384 : index
    %3 = vector.load %arg5[%c0_4, %c384] : memref<1x512xf32, #tpu.memory_space<vmem>>, vector<1x128xf32>
    %c0_5 = arith.constant 0 : index
    %c0_6 = arith.constant 0 : index
    %4 = vector.load %arg2[%c0_5, %c0_6] : memref<32x256xf32, #tpu.memory_space<vmem>>, vector<32x256xf32>
    %cst = arith.constant dense<0.000000e+00> : vector<8x256xf32>
    %5 = tpu.matmul %0, %4, %cst {dimension_numbers = #tpu.dot_dimension_numbers<[1], [0], [0], [1], [0, 0, 1, 1], [], []>} : vector<8x32xf32>, vector<32x256xf32>, vector<8x256xf32> -> vector<8x256xf32>
    %6 = vector.broadcast %1 : vector<1x256xf32> to vector<8x256xf32>
    %7 = arith.addf %5, %6 : vector<8x256xf32>
    %cst_7 = arith.constant 0.000000e+00 : f32
    %8 = vector.broadcast %cst_7 : f32 to vector<8x256xf32>
    %9 = arith.maximumf %7, %8 : vector<8x256xf32>
    %c0_8 = arith.constant 0 : index
    %c0_9 = arith.constant 0 : index
    %10 = vector.load %arg3[%c0_8, %c0_9] : memref<256x128xf32, #tpu.memory_space<vmem>>, vector<256x128xf32>
    %cst_10 = arith.constant dense<0.000000e+00> : vector<8x128xf32>
    %11 = tpu.matmul %9, %10, %cst_10 {dimension_numbers = #tpu.dot_dimension_numbers<[1], [0], [0], [1], [0, 0, 1, 1], [], []>} : vector<8x256xf32>, vector<256x128xf32>, vector<8x128xf32> -> vector<8x128xf32>
    %12 = vector.broadcast %2 : vector<1x128xf32> to vector<8x128xf32>
    %13 = arith.addf %11, %12 : vector<8x128xf32>
    %cst_11 = arith.constant 0.000000e+00 : f32
    %14 = vector.broadcast %cst_11 : f32 to vector<8x128xf32>
    %15 = arith.maximumf %13, %14 : vector<8x128xf32>
    %c0_12 = arith.constant 0 : index
    %c0_13 = arith.constant 0 : index
    %16 = vector.load %arg4[%c0_12, %c0_13] : memref<128x128xf32, #tpu.memory_space<vmem>>, vector<128x128xf32>
    %cst_14 = arith.constant dense<0.000000e+00> : vector<8x128xf32>
    %17 = tpu.matmul %15, %16, %cst_14 {dimension_numbers = #tpu.dot_dimension_numbers<[1], [0], [0], [1], [0, 0, 1, 1], [], []>} : vector<8x128xf32>, vector<128x128xf32>, vector<8x128xf32> -> vector<8x128xf32>
    %18 = vector.broadcast %3 : vector<1x128xf32> to vector<8x128xf32>
    %19 = arith.addf %17, %18 : vector<8x128xf32>
    %c0_15 = arith.constant 0 : index
    %c0_16 = arith.constant 0 : index
    %20 = vector.load %arg6[%c0_15, %c0_16] : memref<8x128xf32, #tpu.memory_space<vmem>>, vector<8x128xf32>
    tpu.vector_store %arg6[%c0_15, %c0_16], %19 {strides = array<i32>} : memref<8x128xf32, #tpu.memory_space<vmem>>, vector<8x128xf32>,
    return
  }
  func.func @transform_0(%arg0: i32) -> (i32, i32) {
    %c0_i32 = arith.constant 0 : i32
    %c0_i32_0 = arith.constant 0 : i32
    return %arg0, %c0_i32 : i32, i32
  }
  func.func @transform_1(%arg0: i32) -> (i32, i32) {
    %c0_i32 = arith.constant 0 : i32
    %c0_i32_0 = arith.constant 0 : i32
    %c0_i32_1 = arith.constant 0 : i32
    return %c0_i32, %c0_i32_0 : i32, i32
  }
  func.func @transform_2(%arg0: i32) -> (i32, i32) {
    %c0_i32 = arith.constant 0 : i32
    %c0_i32_0 = arith.constant 0 : i32
    %c0_i32_1 = arith.constant 0 : i32
    return %c0_i32, %c0_i32_0 : i32, i32
  }
  func.func @transform_3(%arg0: i32) -> (i32, i32) {
    %c0_i32 = arith.constant 0 : i32
    %c0_i32_0 = arith.constant 0 : i32
    %c0_i32_1 = arith.constant 0 : i32
    return %c0_i32, %c0_i32_0 : i32, i32
  }
  func.func @transform_4(%arg0: i32) -> (i32, i32) {
    %c0_i32 = arith.constant 0 : i32
    %c0_i32_0 = arith.constant 0 : i32
    %c0_i32_1 = arith.constant 0 : i32
    return %c0_i32, %c0_i32_0 : i32, i32
  }
  func.func @transform_5(%arg0: i32) -> (i32, i32) {
    %c0_i32 = arith.constant 0 : i32
    %c0_i32_0 = arith.constant 0 : i32
    return %arg0, %c0_i32 : i32, i32
  }
}

</mosaic_0001>

<bundles_post_ra>
// kernel: policy_network_forward.1
= control target key start
LH: loop header
LB: loop body
LE: loop exit
PB: predicated region body
PF: predicated region fallthrough
CT: control target
= control target key end

     0   :  { %10 = vsyncpa [#allocation3], 0  ;;  %s744_s0 = inlined_call_operand.hbm [shape: f32[8,32], index: 0, kind: input, shape index: {}]   ;;  %s745_s1 = inlined_call_operand.hbm [shape: f32[32,256], index: 1, kind: input, shape index: {}]   ;;  %s746_s2 = inlined_call_operand.hbm [shape: f32[256,128], index: 2, kind: input, shape index: {}]   ;;  %s747_s3 = inlined_call_operand.hbm [shape: f32[128,128], index: 3, kind: input, shape index: {}]   ;;  %s748_s4 = inlined_call_operand.vmem [shape: f32[1,512], index: 4, kind: input, shape index: {}]   ;;  %s749_s5 = inlined_call_operand.vmem [shape: f32[8,128], index: 5, kind: output, shape index: {}]  }
   0x1   :  { %11 = vsyncpa [#allocation5], 0 }
   0x2   :  { %12 = vsyncpa [#allocation8], 0  ;;  %s641_s18 = smov [#allocation4]   ;;  %s547_s22 = scalar_lea.hbm %s745_s1, 1024 }
   0x3   :  { %s28_s19 = sshll.u32 %s641_s18, 4  ;;  %p548_p0 = scmp.ne.s32.totalorder %s745_s1, %s547_s22  ;;  %s29_s19 = int_to_ptr.vmem [resolvable:$true] %s28_s19 }
   0x4   :  { %p551_p1 = scmp.lt.u32.totalorder %s547_s22, %s745_s1 }
   0x6   :  { %p553_p2 = pnand %p551_p1, %p548_p0 }
   0x8   :  { %556 = shalt.err (!%p553_p2)
}
   0x9   :  { %s557_s27 = scalar_lea.vmem %s29_s19, 1024  ;;  %p562_p4 = scmp.lt.s32.totalorder %s29_s19, %s29_s19 }
   0xa   :  { %p558_p3 = scmp.ne.s32.totalorder %s29_s19, %s557_s27  ;;  %p563_p5 = scmp.lt.s32.totalorder %s557_s27, %s557_s27 }
   0xc   :  { %p564_p6 = por %p563_p5, %p562_p4 }
   0xe   :  { %p565_p7 = pnand %p564_p6, %p558_p3 }
  0x10   :  { %568 = shalt.err (!%p565_p7)
}
  0x11   :  { %s642_s28 = smov 256   ;;  %s643_s29 = smov 16  }
  0x12   :  { %34 = dma.hbm_to_vmem [thread:$0]  %s745_s1, 1024, %s29_s19, [#allocation5], %s642_s28, %s642_s28, %s643_s29  }
  0x13   :  { %s644_s7 = smov [#allocation2]   ;;  %s645_s9 = smov [#allocation6]  }
  0x14   :  { %s19_s8 = sshll.u32 %s644_s7, 4  ;;  %s40_s10 = sshll.u32 %s645_s9, 4  ;;  %s20_s8 = int_to_ptr.vmem [resolvable:$true] %s19_s8  ;;  %s41_s10 = int_to_ptr.vmem [resolvable:$true] %s40_s10 }
  0x15   :  { %s569_s13 = scalar_lea.hbm %s744_s0, 128 }
  0x16   :  { %p570_p8 = scmp.ne.s32.totalorder %s744_s0, %s569_s13  ;;  %p573_p9 = scmp.lt.u32.totalorder %s569_s13, %s744_s0 }
  0x18   :  { %p575_p10 = pnand %p573_p9, %p570_p8 }
  0x1a   :  { %578 = shalt.err (!%p575_p10)
}
  0x1b   :  { %s579_s1 = scalar_lea.vmem %s20_s8, 128  ;;  %p584_p12 = scmp.lt.s32.totalorder %s20_s8, %s20_s8 }
  0x1c   :  { %p580_p11 = scmp.ne.s32.totalorder %s20_s8, %s579_s1  ;;  %p585_p13 = scmp.lt.s32.totalorder %s579_s1, %s579_s1 }
  0x1e   :  { %p586_p0 = por %p585_p13, %p584_p12 }
  0x20   :  { %p587_p1 = pnand %p586_p0, %p580_p11 }
  0x22   :  { %590 = shalt.err (!%p587_p1)
}
  0x23   :  { %22 = dma.hbm_to_vmem [thread:$0]  %s744_s0, 128, %s20_s8, [#allocation3]  }
  0x24   :  { %s591_s22 = scalar_lea.hbm %s746_s2, 4096 }
  0x25   :  { %p592_p2 = scmp.ne.s32.totalorder %s746_s2, %s591_s22  ;;  %p595_p3 = scmp.lt.u32.totalorder %s591_s22, %s746_s2 }
  0x27   :  { %p597_p4 = pnand %p595_p3, %p592_p2 }
  0x29   :  { %600 = shalt.err (!%p597_p4)
}
  0x2a   :  { %s601_s27 = scalar_lea.vmem %s41_s10, 4096  ;;  %p606_p6 = scmp.lt.s32.totalorder %s41_s10, %s41_s10 }
  0x2b   :  { %p602_p5 = scmp.ne.s32.totalorder %s41_s10, %s601_s27  ;;  %p607_p7 = scmp.lt.s32.totalorder %s601_s27, %s601_s27 }
  0x2d   :  { %p608_p8 = por %p607_p7, %p606_p6 }
  0x2f   :  { %p609_p9 = pnand %p608_p8, %p602_p5 }
  0x31   :  { %612 = shalt.err (!%p609_p9)
}
  0x32   :  { %s646_s0 = smov 128   ;;  %s647_s28 = smov 8  }
  0x33   :  { %46 = dma.hbm_to_vmem [thread:$0]  %s746_s2, 4096, %s41_s10, [#allocation5], %s646_s0, %s646_s0, %s647_s28  }
  0x34   :  { %s648_s6 = smov [#allocation7]   ;;  %s613_s11 = scalar_lea.hbm %s747_s3, 2048 }
  0x35   :  { %s52_s7 = sshll.u32 %s648_s6, 4  ;;  %p614_p10 = scmp.ne.s32.totalorder %s747_s3, %s613_s11  ;;  %s53_s7 = int_to_ptr.vmem [resolvable:$true] %s52_s7 }
  0x36   :  { %p617_p11 = scmp.lt.u32.totalorder %s613_s11, %s747_s3 }
  0x38   :  { %p619_p12 = pnand %p617_p11, %p614_p10 }
  0x3a   :  { %622 = shalt.err (!%p619_p12)
}
  0x3b   :  { %s623_s16 = scalar_lea.vmem %s53_s7, 2048  ;;  %p628_p0 = scmp.lt.s32.totalorder %s53_s7, %s53_s7 }
  0x3c   :  { %p624_p13 = scmp.ne.s32.totalorder %s53_s7, %s623_s16  ;;  %p629_p1 = scmp.lt.s32.totalorder %s623_s16, %s623_s16 }
  0x3e   :  { %p630_p2 = por %p629_p1, %p628_p0 }
  0x40   :  { %p631_p3 = pnand %p630_p2, %p624_p13 }
  0x42   :  { %634 = shalt.err (!%p631_p3)
}
  0x43   :  { %58 = dma.hbm_to_vmem [thread:$0]  %s747_s3, 2048, %s53_s7, [#allocation8], %s646_s0, %s646_s0, %s647_s28  }
  0x44   :  { %635 = dma.done.wait [#allocation3], 128  }
  0x45   :  { %636 = vsyncadd [#allocation3], 4294967168 }
  0x46   :  { %637 = dma.done.wait [#allocation5], 5120  }
  0x47   :  { %638 = vsyncadd [#allocation5], 4294962176 }
  0x48   :  { %639 = dma.done.wait [#allocation8], 2048  }
  0x49   :  { %640 = vsyncadd [#allocation8], 4294965248  ;;  %v649_v0 = vmov 0.0   ;;  %v78_v1 = vld [vmem:[#allocation4 + $0x8] sm:$0xff]  ;;  %v80_v2 = vld [vmem:[#allocation4 + $0x18] sm:$0xff]  ;;  %vm96_vm0 = vcmask 261120  }
  0x4a   :  { %164 = vmatprep.mubr.f32.mxu0 %v649_v0  ;;  %v77_v3 = vld [vmem:[#allocation4] sm:$0xff]  ;;  %v472_v4 = vpack.c.bf16 %v80_v2, %v78_v1  ;;  %v79_v5 = vld [vmem:[#allocation4 + $0x10] sm:$0xff]  ;;  %v82_v6 = vld [vmem:[#allocation4 + $0x28] sm:$0xff]  ;;  %v650_v2 = vmov 0.0|0.0   ;;  %vm651_vm1 = vmmov 0  }
  0x4b   :  { %v84_v7 = vld [vmem:[#allocation4 + $0x38] sm:$0xff]  ;;  %v474_v8 = vpack.c.bf16 %v79_v5, %v77_v3  ;;  %v81_v10 = vld [vmem:[#allocation4 + $0x20] sm:$0xff]  ;;  %v83_v11 = vld [vmem:[#allocation4 + $0x30] sm:$0xff] }
  0x4c   :  { %v476_v9 = vpack.c.bf16 %v84_v7, %v82_v6  ;;  %473 = vmatprep.subr.bf16.mxu0 %v472_v4  ;;  %v189_v12 = vld [vmem:[#allocation6 + $0x80] sm:$0xff]  ;;  %v190_v13 = vld [vmem:[#allocation6 + $0x88] sm:$0xff]  ;;  %v478_v15 = vpack.c.bf16 %v83_v11, %v81_v10  ;;  %v191_v18 = vld [vmem:[#allocation6 + $0x90] sm:$0xff] }
  0x4d   :  { %v173_v14 = vld [vmem:[#allocation6] sm:$0xff]  ;;  %475 = vmatpush1.bf16.msra.mxu0 %v474_v8  ;;  %v480_v16 = vpack.c.bf16 %v190_v13, %v189_v12  ;;  %v174_v17 = vld [vmem:[#allocation6 + $0x8] sm:$0xff]  ;;  %v192_v19 = vld [vmem:[#allocation6 + $0x98] sm:$0xff] }
  0x4e   :  { %477 = vmatprep.subr.bf16.mxu0 %v476_v9  ;;  %v482_v20 = vpack.c.bf16 %v174_v17, %v173_v14  ;;  %v484_v21 = vpack.c.bf16 %v192_v19, %v191_v18  ;;  %v175_v22 = vld [vmem:[#allocation6 + $0x10] sm:$0xff]  ;;  %v176_v23 = vld [vmem:[#allocation6 + $0x18] sm:$0xff]  ;;  %v193_v24 = vld [vmem:[#allocation6 + $0xa0] sm:$0xff]  ;;  %v86_v18 = vlaneseq }
  0x4f   :  { %481 = vmatprep.subr.bf16.mxu1 %v480_v16  ;;  %v194_v25 = vld [vmem:[#allocation6 + $0xa8] sm:$0xff]  ;;  %v486_v26 = vpack.c.bf16 %v176_v23, %v175_v22  ;;  %v73_v27 = vld [vmem:[#allocation2] sm:$0xff]  ;;  %v177_v29 = vld [vmem:[#allocation6 + $0x20] sm:$0xff] }
  0x50   :  { %483 = vmatpush3.bf16.msra.mxu1 %v482_v20  ;;  %v488_v28 = vpack.c.bf16 %v194_v25, %v193_v24  ;;  %v178_v30 = vld [vmem:[#allocation6 + $0x28] sm:$0xff]  ;;  %v195_v31 = vld [vmem:[#allocation6 + $0xb0] sm:$0xff]  ;;  %v196_v32 = vld [vmem:[#allocation6 + $0xb8] sm:$0xff]  ;;  %v87_v19 = vshrl.u32 %v86_v18, 7 }
  0x51   :  { %479 = vmatpush1.bf16.msra.mxu0 %v478_v15  ;;  %485 = vmatprep.subr.bf16.mxu1 %v484_v21  ;;  %v490_v33 = vpack.c.bf16 %v178_v30, %v177_v29  ;;  %v492_v34 = vpack.c.bf16 %v196_v32, %v195_v31  ;;  %v179_v35 = vld [vmem:[#allocation6 + $0x30] sm:$0xff]  ;;  %v180_v36 = vld [vmem:[#allocation6 + $0x38] sm:$0xff]  ;;  %v197_v37 = vld [vmem:[#allocation6 + $0xc0] sm:$0xff] }
  0x52   :  { %v198_v38 = vld [vmem:[#allocation6 + $0xc8] sm:$0xff]  ;;  %v494_v39 = vpack.c.bf16 %v180_v36, %v179_v35  ;;  %v181_v41 = vld [vmem:[#allocation6 + $0x40] sm:$0xff]  ;;  %v199_v43 = vld [vmem:[#allocation6 + $0xd0] sm:$0xff]  ;;  %512 = vmatprep.subr.bf16.mxu0 %v650_v2  ;;  %v88_v20 = vsub.s32 0, %v87_v19  ;;  %v92_v22 = vsub.s32 1, %v87_v19 }
  0x53   :  { %v496_v40 = vpack.c.bf16 %v198_v38, %v197_v37  ;;  %v182_v42 = vld [vmem:[#allocation6 + $0x48] sm:$0xff]  ;;  %v200_v44 = vld [vmem:[#allocation6 + $0xd8] sm:$0xff]  ;;  %v183_v47 = vld [vmem:[#allocation6 + $0x50] sm:$0xff] }
  0x54   :  { %382 = vmatmul.mubr.msk.f32.vlgmr.msra.gmra.mrb[0].mxu0 %vm96_vm0, %v73_v27  ;;  %487 = vmatpush3.bf16.msra.mxu1 %v486_v26  ;;  %v498_v45 = vpack.c.bf16 %v182_v42, %v181_v41  ;;  %v500_v46 = vpack.c.bf16 %v200_v44, %v199_v43  ;;  %v184_v48 = vld [vmem:[#allocation6 + $0x58] sm:$0xff]  ;;  %v201_v49 = vld [vmem:[#allocation6 + $0xe0] sm:$0xff]  ;;  %v202_v50 = vld [vmem:[#allocation6 + $0xe8] sm:$0xff] }
  0x55   :  { %489 = vmatprep.subr.bf16.mxu1 %v488_v28  ;;  %v502_v51 = vpack.c.bf16 %v184_v48, %v183_v47  ;;  %v504_v52 = vpack.c.bf16 %v202_v50, %v201_v49  ;;  %v185_v53 = vld [vmem:[#allocation6 + $0x60] sm:$0xff]  ;;  %v186_v54 = vld [vmem:[#allocation6 + $0x68] sm:$0xff]  ;;  %v203_v56 = vld [vmem:[#allocation6 + $0xf0] sm:$0xff]  ;;  %469 = vmatprep.mubr.msk.f32.mxu0 %vm651_vm1, %v649_v0 }
  0x56   :  { %v506_v55 = vpack.c.bf16 %v186_v54, %v185_v53  ;;  %v204_v57 = vld [vmem:[#allocation6 + $0xf8] sm:$0xff]  ;;  %v187_v59 = vld [vmem:[#allocation6 + $0x70] sm:$0xff]  ;;  %v282_v62 = vld [vmem:[#allocation7] sm:$0xff] }
  0x57   :  { %v508_v58 = vpack.c.bf16 %v204_v57, %v203_v56  ;;  %v188_v60 = vld [vmem:[#allocation6 + $0x78] sm:$0xff]  ;;  %v283_v63 = vld [vmem:[#allocation7 + $0x8] sm:$0xff]  ;;  %v284_v1 = vld [vmem:[#allocation7 + $0x10] sm:$0xff] }
  0x58   :  { %491 = vmatpush3.bf16.msra.mxu1 %v490_v33  ;;  %v510_v61 = vpack.c.bf16 %v188_v60, %v187_v59  ;;  %v513_v3 = vpack.c.bf16 %v283_v63, %v282_v62  ;;  %v285_v4 = vld [vmem:[#allocation7 + $0x18] sm:$0xff]  ;;  %v286_v6 = vld [vmem:[#allocation7 + $0x20] sm:$0xff]  ;;  %v287_v7 = vld [vmem:[#allocation7 + $0x28] sm:$0xff] }
  0x59   :  { %493 = vmatprep.subr.bf16.mxu1 %v492_v34  ;;  %v516_v5 = vpack.c.bf16 %v285_v4, %v284_v1  ;;  %v519_v8 = vpack.c.bf16 %v287_v7, %v286_v6  ;;  %v288_v9 = vld [vmem:[#allocation7 + $0x30] sm:$0xff]  ;;  %v289_v10 = vld [vmem:[#allocation7 + $0x38] sm:$0xff]  ;;  %v290_v12 = vld [vmem:[#allocation7 + $0x40] sm:$0xff] }
  0x5a   :  { %514 = vmatpush3.bf16.msra.mxu0 %v513_v3  ;;  %v522_v11 = vpack.c.bf16 %v289_v10, %v288_v9  ;;  %v291_v13 = vld [vmem:[#allocation7 + $0x48] sm:$0xff]  ;;  %v292_v15 = vld [vmem:[#allocation7 + $0x50] sm:$0xff]  ;;  %v293_v16 = vld [vmem:[#allocation7 + $0x58] sm:$0xff] }
  0x5b   :  { %515 = vmatprep.subr.bf16.mxu0 %v650_v2  ;;  %v525_v14 = vpack.c.bf16 %v291_v13, %v290_v12  ;;  %v528_v17 = vpack.c.bf16 %v293_v16, %v292_v15  ;;  %v74_v21 = vld [vmem:[%s748_s4] sm:$0x3]  ;;  %v294_v31 = vld [vmem:[#allocation7 + $0x60] sm:$0xff]  ;;  %v295_v32 = vld [vmem:[#allocation7 + $0x68] sm:$0xff] }
  0x5c   :  { %495 = vmatpush3.bf16.msra.mxu1 %v494_v39  ;;  %v89_v23 = vrot.slane %v74_v21, %v88_v20  ;;  %v93_v24 = vrot.slane %v74_v21, %v92_v22  ;;  %v531_v33 = vpack.c.bf16 %v295_v32, %v294_v31  ;;  %v296_v34 = vld [vmem:[#allocation7 + $0x70] sm:$0xff]  ;;  %v297_v35 = vld [vmem:[#allocation7 + $0x78] sm:$0xff] }
  0x5d   :  { %497 = vmatprep.subr.bf16.mxu1 %v496_v40  ;;  %v534_v36 = vpack.c.bf16 %v297_v35, %v296_v34  ;;  %v383_v38 = vld [vmem:[%s748_s4 + $0x2] ss:$0 sm:$0xff]  ;;  %v384_v43 = vld [vmem:[%s748_s4 + $0x3] ss:$0 sm:$0xff] }
  0x5e   :  { %517 = vmatpush3.bf16.msra.mxu0 %v516_v5 }
  0x5f   :  { %518 = vmatprep.subr.bf16.mxu0 %v650_v2 }
  0x60   :  { %499 = vmatpush3.bf16.msra.mxu1 %v498_v45 }
  0x61   :  { %501 = vmatprep.subr.bf16.mxu1 %v500_v46 }
  0x62   :  { %520 = vmatpush3.bf16.msra.mxu0 %v519_v8 }
  0x63   :  { %521 = vmatprep.subr.bf16.mxu0 %v650_v2 }
  0x64   :  { %503 = vmatpush3.bf16.msra.mxu1 %v502_v51 }
  0x65   :  { %505 = vmatprep.subr.bf16.mxu1 %v504_v52 }
  0x66   :  { %523 = vmatpush3.bf16.msra.mxu0 %v522_v11 }
  0x67   :  { %524 = vmatprep.subr.bf16.mxu0 %v650_v2 }
  0x68   :  { %507 = vmatpush3.bf16.msra.mxu1 %v506_v55 }
  0x69   :  { %509 = vmatprep.subr.bf16.mxu1 %v508_v58 }
  0x6a   :  { %526 = vmatpush3.bf16.msra.mxu0 %v525_v14 }
  0x6b   :  { %527 = vmatprep.subr.bf16.mxu0 %v650_v2 }
  0x6c   :  { %511 = vmatpush3.bf16.msra.mxu1 %v510_v61 }
  0x6e   :  { %529 = vmatpush3.bf16.msra.mxu0 %v528_v17 }
  0x6f   :  { %530 = vmatprep.subr.bf16.mxu0 %v650_v2 }
  0x72   :  { %532 = vmatpush3.bf16.msra.mxu0 %v531_v33 }
  0x73   :  { %533 = vmatprep.subr.bf16.mxu0 %v650_v2 }
  0x76   :  { %535 = vmatpush3.bf16.msra.mxu0 %v534_v36 }
 0x127   :  { %v166_v25 = vpop.f32.mrb[0].mxu0 }
 0x128   :  { %v167_v26 = vadd.f32 %v166_v25, %v89_v23  ;;  %v168_v27 = vpop.f32.mrb[1].mxu0 }
 0x129   :  { %v169_v28 = vadd.f32 %v168_v27, %v93_v24 }
 0x12a   :  { %v171_v30 = vmax.f32 %v167_v26, 0.0 }
 0x12b   :  { %v172_v29 = vmax.f32 %v169_v28, 0.0 }
 0x12d   :  { %275 = vmatprep.mubr.f32.mxu1 %v172_v29 }
 0x12e   :  { %276 = vmatmul.mubr.f32.vlgmr.msra.gmra.mrb[0].mxu1 %v171_v30 }
 0x201   :  { %v417_v37 = vpop.f32.mrb[0].mxu1 }
 0x202   :  { %v418_v39 = vpop.f32.mrb[1].mxu1 }
 0x203   :  { %v419_v40 = vadd.f32 %v418_v39, %v417_v37 }
 0x205   :  { %v278_v41 = vadd.f32 %v419_v40, %v383_v38 }
 0x207   :  { %v281_v42 = vmax.f32 %v278_v41, 0.0 }
 0x209   :  { %470 = vmatmul.mubr.f32.vlgmr.msra.gmra.mrb[2].mxu0 %v281_v42 }
 0x2dc   :  { %v370_v44 = vpop.f32.mrb[2].mxu0 }
 0x2dd   :  { %v371_v45 = vadd.f32 %v384_v43, %v370_v44  ;;  %v471_v46 = vpop.f32.mrb[3].mxu0 }
 0x2df   :  { %374 = vst [vmem:[%s749_s5] sm:$0xff] %v371_v45 }
 0x2e0   :  { %379 = vsyncpa [#allocation3], 1 }
 0x2e1   :  { %380 = vsyncpa [#allocation5], 1 }
 0x2e2   :  { %381 = vsyncpa [#allocation8], 1 }

</bundles_post_ra>
